<compile_context>
chip_gen: v7x
topology: tpu7x:2x2x1
jax: 0.10.0
libtpu: 0.0.40
codegen_flags: <defaults>
</compile_context>

<pallas_src>
import functools

import jax
import jax.numpy as jnp
from jax import lax
from jax.experimental import pallas as pl
from jax.experimental.pallas import tpu as pltpu


def _pseudo_huber_partial_kernel(
    y_ref, yp_ref, out_ref, *, inv_delta_sq, steps_per_core, tr, full_rows, needs_edge
):
    """Accumulate sum(sqrt(1 + (d/delta)^2) - 1) into a resident (8,128) block."""
    c = pl.program_id(0)   # TensorCore axis (size 2 on v7x, 1 elsewhere)
    i = pl.program_id(1)   # reduction axis over row-tiles

    @pl.when(i == 0)
    def _init():
        out_ref[...] = jnp.zeros_like(out_ref)

    # Elementwise hot path: sub, 2 muls, 2 adds on the VPU + one EUP sqrt.
    d = y_ref[...].astype(jnp.float32) - yp_ref[...].astype(jnp.float32)
    val = jnp.sqrt(1.0 + (d * d) * inv_delta_sq) - 1.0

    def _accum(v):
        # (tr,128) -> (8,128): vreg-aligned VPU adds; the expensive cross-lane
        # reduction happens once, outside the kernel.
        out_ref[...] += jnp.sum(v.reshape(-1, 8, 128), axis=0)[None, :, :]

    if not needs_edge:
        # Statically known: every tile of every step is fully in range.
        _accum(val)
    else:
        gstep = c * steps_per_core + i          # global row-tile index
        full_steps = full_rows // tr            # tiles whose rows are all valid

        @pl.when(gstep < full_steps)
        def _full_tile():
            _accum(val)

        @pl.when(gstep >= full_steps)
        def _edge_tile():
            # Masks rows past the end of the array (partial last tile) and
            # whole duplicated tiles (odd split across cores).
            rows = gstep * tr + lax.broadcasted_iota(jnp.int32, (tr, 128), 0)
            _accum(jnp.where(rows < full_rows, val, 0.0))


def _device_kind():
    try:
        return jax.devices()[0].device_kind.lower()
    except Exception:  # be safe on exotic backends
        return ""


def huber_loss_pallas(y_t, y_prime_t, delta=1.0, *, tile_bytes=None):
    """Pseudo-Huber loss matching the torch module's forward (reduced in f32).

    `delta` must be a static Python number (baked in at trace time).
    """
    assert y_t.shape == y_prime_t.shape, "shapes must match (no broadcasting used)"
    delta = float(delta)
    assert delta != 0.0, "delta must be non-zero"
    delta_sq = delta * delta
    inv_delta_sq = 1.0 / delta_sq

    n = y_t.size
    lanes = 128

    # Flatten in native dtype (free for contiguous arrays); cast to f32 only
    # inside the kernel so bf16/f16 inputs stream half the HBM bytes.
    y_flat = jnp.ravel(y_t)
    yp_flat = jnp.ravel(y_prime_t)

    full_rows = n // lanes
    rem = n - full_rows * lanes

    total = jnp.float32(0.0)

    if full_rows > 0:
        itemsize = max(
            jnp.dtype(y_t.dtype).itemsize, jnp.dtype(y_prime_t.dtype).itemsize
        )
        is_v7 = "v7" in _device_kind()

        # ~2 MiB per input tile (4 MiB on v7x): big enough to amortise the
        # fixed per-step overhead, small enough that 2 inputs x 2 pipeline
        # buffers fit every chip's default scoped-VMEM limit (no explicit
        # vmem_limit_bytes / Buffered(3) needed).
        if tile_bytes is None:
            tile_bytes = (4 if is_v7 else 2) * 1024 * 1024
        granule = max(8, 32 // itemsize)          # (8,128) f32 / (16,128) bf16
        tr = max(granule, (tile_bytes // (lanes * itemsize)) // granule * granule)
        tr = min(tr, -(-full_rows // granule) * granule)   # don't exceed the data

        steps_total = -(-full_rows // tr)                  # ceil
        # Split across the two v7x TensorCores only; v5e/v6e have a single TC
        # and an extra axis would just be a serial loop split.
        num_cores = 2 if (is_v7 and steps_total >= 2) else 1
        steps_per_core = -(-steps_total // num_cores)
        needs_edge = (full_rows % tr != 0) or (num_cores * steps_per_core != steps_total)

        if rem == 0:
            y2d = y_flat.reshape(full_rows, lanes)          # zero-copy reshape
            yp2d = yp_flat.reshape(full_rows, lanes)
        else:
            # Rare path (n % 128 != 0): slicing materialises a copy of the
            # 128-aligned prefix; the <128-element tail is handled in JAX.
            y2d = y_flat[: full_rows * lanes].reshape(full_rows, lanes)
            yp2d = yp_flat[: full_rows * lanes].reshape(full_rows, lanes)

        def in_index_map(c, i, spc=steps_per_core, last=steps_total - 1):
            # Clamp so an odd split across cores never DMAs past the array;
            # the kernel masks the duplicated tile to zero.
            return (jnp.minimum(c * spc + i, last), 0)

        kernel = functools.partial(
            _pseudo_huber_partial_kernel,
            inv_delta_sq=inv_delta_sq,
            steps_per_core=steps_per_core,
            tr=tr,
            full_rows=full_rows,
            needs_edge=needs_edge,
        )

        dims = (
            pltpu.CORE_PARALLEL if num_cores == 2 else pltpu.ARBITRARY,
            pltpu.ARBITRARY,
        )

        in_bytes = 2 * full_rows * lanes * itemsize
        partials = pl.pallas_call(
            kernel,
            out_shape=jax.ShapeDtypeStruct((num_cores, 8, lanes), jnp.float32),
            grid_spec=pltpu.PrefetchScalarGridSpec(
                num_scalar_prefetch=0,
                grid=(num_cores, steps_per_core),
                in_specs=[
                    pl.BlockSpec((tr, lanes), in_index_map),
                    pl.BlockSpec((tr, lanes), in_index_map),
                ],
                # Same output block across the reduction axis -> resident f32
                # accumulator in VMEM; one block per core along axis 0.
                out_specs=pl.BlockSpec((1, 8, lanes), lambda c, i: (c, 0, 0)),
            ),
            compiler_params=pltpu.CompilerParams(dimension_semantics=dims),
            cost_estimate=pl.CostEstimate(
                flops=6 * full_rows * lanes,
                transcendentals=full_rows * lanes,
                bytes_accessed=in_bytes + num_cores * 8 * lanes * 4,
            ),
        )(y2d, yp2d)
        total = total + jnp.sum(partials)

    # Lane tail (< 128 elements) in plain JAX.
    if rem > 0:
        dt = (
            y_flat[full_rows * lanes :].astype(jnp.float32)
            - yp_flat[full_rows * lanes :].astype(jnp.float32)
        )
        total = total + jnp.sum(jnp.sqrt(1.0 + (dt * dt) * inv_delta_sq) - 1.0)

    # Hoisted affine scale + mean (delta^2 applied once, outside the kernel).
    return total * jnp.float32(delta_sq / n)


def huber_loss_ref(y_t, y_prime_t, delta=1.0):
    ey = y_t.astype(jnp.float32) - y_prime_t.astype(jnp.float32)
    return jnp.mean(delta**2 * (jnp.sqrt(1.0 + (ey / delta) ** 2) - 1.0))


if __name__ == "__main__":
    key = jax.random.PRNGKey(0)
    k1, k2 = jax.random.split(key)
    # Small shapes consistent with a generic regression target tensor.
    shape = (2, 4, 16, 16)
    y_t = jax.random.normal(k1, shape, dtype=jnp.float32)
    y_prime_t = jax.random.normal(k2, shape, dtype=jnp.float32)

    out = huber_loss_pallas(y_t, y_prime_t, delta=1.0)
    out = jax.block_until_ready(out)

    ref = huber_loss_ref(y_t, y_prime_t, delta=1.0)
    assert jnp.allclose(out, ref, rtol=1e-5, atol=1e-6), (out, ref)
    print("KERNEL_OK")
</pallas_src>

<mosaic_0001>
module attributes {stable_mosaic.version = 11 : i64} {
  func.func @_pseudo_huber_partial_kernel(%arg0: i32, %arg1: i32, %arg2: memref<16x128xf32, #tpu.memory_space<vmem>>, %arg3: memref<16x128xf32, #tpu.memory_space<vmem>>, %arg4: memref<1x8x128xf32, #tpu.memory_space<vmem>>) attributes {dimension_semantics = [#tpu.dimension_semantics<arbitrary>, #tpu.dimension_semantics<arbitrary>], iteration_bounds = array<i64: 1, 1>, scalar_prefetch = 0 : i64, scratch_operands = 0 : i64, tpu.core_type = #tpu.core_type<tc>, window_params = [{transform_indices = @transform_0, window_bounds = array<i64: 16, 128>}, {transform_indices = @transform_1, window_bounds = array<i64: 16, 128>}, {transform_indices = @transform_2, window_bounds = array<i64: 1, 8, 128>}]} {
    %c0_i32 = arith.constant 0 : i32
    %0 = arith.cmpi eq, %arg1, %c0_i32 : i32
    %1 = arith.extui %0 : i1 to i32
    %c0_i32_0 = arith.constant 0 : i32
    %2 = arith.cmpi ne, %1, %c0_i32_0 : i32
    scf.if %2 {
      %cst_13 = arith.constant 0.000000e+00 : f32
      %20 = vector.broadcast %cst_13 : f32 to vector<1x8x128xf32>
      %c0_14 = arith.constant 0 : index
      %c0_15 = arith.constant 0 : index
      %c0_16 = arith.constant 0 : index
      %21 = vector.load %arg4[%c0_14, %c0_15, %c0_16] : memref<1x8x128xf32, #tpu.memory_space<vmem>>, vector<1x8x128xf32>
      tpu.vector_store %arg4[%c0_14, %c0_15, %c0_16], %20 {strides = array<i32>} : memref<1x8x128xf32, #tpu.memory_space<vmem>>, vector<1x8x128xf32>,
    } else {
    }
    %c0 = arith.constant 0 : index
    %c0_1 = arith.constant 0 : index
    %3 = vector.load %arg2[%c0, %c0_1] : memref<16x128xf32, #tpu.memory_space<vmem>>, vector<16x128xf32>
    %c0_2 = arith.constant 0 : index
    %c0_3 = arith.constant 0 : index
    %4 = vector.load %arg3[%c0_2, %c0_3] : memref<16x128xf32, #tpu.memory_space<vmem>>, vector<16x128xf32>
    %5 = arith.subf %3, %4 : vector<16x128xf32>
    %6 = arith.mulf %5, %5 : vector<16x128xf32>
    %cst = arith.constant 1.000000e+00 : f32
    %7 = vector.broadcast %cst : f32 to vector<16x128xf32>
    %8 = arith.mulf %6, %7 : vector<16x128xf32>
    %cst_4 = arith.constant 1.000000e+00 : f32
    %9 = vector.broadcast %cst_4 : f32 to vector<16x128xf32>
    %10 = arith.addf %9, %8 : vector<16x128xf32>
    %11 = math.sqrt %10 : vector<16x128xf32>
    %cst_5 = arith.constant 1.000000e+00 : f32
    %12 = vector.broadcast %cst_5 : f32 to vector<16x128xf32>
    %13 = arith.subf %11, %12 : vector<16x128xf32>
    %c0_6 = arith.constant 0 : index
    %c0_7 = arith.constant 0 : index
    %c0_8 = arith.constant 0 : index
    %14 = vector.load %arg4[%c0_6, %c0_7, %c0_8] : memref<1x8x128xf32, #tpu.memory_space<vmem>>, vector<1x8x128xf32>
    %15 = vector.shape_cast %13 : vector<16x128xf32> to vector<2x8x128xf32>
    %cst_9 = arith.constant dense<0.000000e+00> : vector<8x128xf32>
    %16 = vector.multi_reduction <add>, %15, %cst_9 [0] : vector<2x8x128xf32> to vector<8x128xf32>
    %17 = vector.shape_cast %16 : vector<8x128xf32> to vector<1x8x128xf32>
    %18 = arith.addf %14, %17 : vector<1x8x128xf32>
    %c0_10 = arith.constant 0 : index
    %c0_11 = arith.constant 0 : index
    %c0_12 = arith.constant 0 : index
    %19 = vector.load %arg4[%c0_10, %c0_11, %c0_12] : memref<1x8x128xf32, #tpu.memory_space<vmem>>, vector<1x8x128xf32>
    tpu.vector_store %arg4[%c0_10, %c0_11, %c0_12], %18 {strides = array<i32>} : memref<1x8x128xf32, #tpu.memory_space<vmem>>, vector<1x8x128xf32>,
    return
  }
  func.func @transform_0(%arg0: i32, %arg1: i32) -> (i32, i32) {
    %c1_i32 = arith.constant 1 : i32
    %0 = arith.muli %arg0, %c1_i32 : i32
    %1 = arith.addi %0, %arg1 : i32
    %c0_i32 = arith.constant 0 : i32
    %2 = arith.minsi %1, %c0_i32 : i32
    %c0_i32_0 = arith.constant 0 : i32
    %c0_i32_1 = arith.constant 0 : i32
    return %2, %c0_i32_0 : i32, i32
  }
  func.func @transform_1(%arg0: i32, %arg1: i32) -> (i32, i32) {
    %c1_i32 = arith.constant 1 : i32
    %0 = arith.muli %arg0, %c1_i32 : i32
    %1 = arith.addi %0, %arg1 : i32
    %c0_i32 = arith.constant 0 : i32
    %2 = arith.minsi %1, %c0_i32 : i32
    %c0_i32_0 = arith.constant 0 : i32
    %c0_i32_1 = arith.constant 0 : i32
    return %2, %c0_i32_0 : i32, i32
  }
  func.func @transform_2(%arg0: i32, %arg1: i32) -> (i32, i32, i32) {
    %c0_i32 = arith.constant 0 : i32
    %c0_i32_0 = arith.constant 0 : i32
    %c0_i32_1 = arith.constant 0 : i32
    return %arg0, %c0_i32, %c0_i32_0 : i32, i32, i32
  }
}

</mosaic_0001>

<bundles_post_ra>
// kernel: tpu_custom_call.1
= control target key start
LH: loop header
LB: loop body
LE: loop exit
PB: predicated region body
PF: predicated region fallthrough
CT: control target
= control target key end

     0   :  { %7 = vsyncpa [#allocation3], 0  ;;  %s255_s0 = inlined_call_operand.hbm [shape: f32[16,128], index: 0, kind: input, shape index: {}]   ;;  %s256_s1 = inlined_call_operand.hbm [shape: f32[16,128], index: 1, kind: input, shape index: {}]   ;;  %s257_s2 = inlined_call_operand.hbm [shape: f32[1,8,128], index: 2, kind: output, shape index: {}]  }
   0x1   :  { %8 = vsyncpa [#allocation6], 0 }
   0x2   :  { %9 = vsyncpa [#allocation4], 0  ;;  %s199_s9 = smov [#allocation2]   ;;  %s127_s13 = scalar_lea.hbm %s255_s0, 256 }
   0x3   :  { %s21_s10 = sshll.u32 %s199_s9, 4  ;;  %p128_p0 = scmp.ne.s32.totalorder %s255_s0, %s127_s13  ;;  %s22_s10 = int_to_ptr.vmem [resolvable:$true] %s21_s10 }
   0x4   :  { %p131_p1 = scmp.lt.u32.totalorder %s127_s13, %s255_s0 }
   0x6   :  { %p133_p2 = pnand %p131_p1, %p128_p0 }
   0x8   :  { %136 = shalt.err (!%p133_p2)
}
   0x9   :  { %s137_s18 = scalar_lea.vmem %s22_s10, 256  ;;  %p142_p4 = scmp.lt.s32.totalorder %s22_s10, %s22_s10 }
   0xa   :  { %p138_p3 = scmp.ne.s32.totalorder %s22_s10, %s137_s18  ;;  %p143_p5 = scmp.lt.s32.totalorder %s137_s18, %s137_s18 }
   0xc   :  { %p144_p6 = por %p143_p5, %p142_p4 }
   0xe   :  { %p145_p7 = pnand %p144_p6, %p138_p3 }
  0x10   :  { %148 = shalt.err (!%p145_p7)
}
  0x11   :  { %s200_s19 = smov 128   ;;  %s201_s20 = smov 8  }
  0x12   :  { %27 = dma.hbm_to_vmem [thread:$0]  %s255_s0, 256, %s22_s10, [#allocation3], %s200_s19, %s200_s19, %s201_s20  }
  0x13   :  { %s202_s23 = smov [#allocation5]   ;;  %s149_s27 = scalar_lea.hbm %s256_s1, 256 }
  0x14   :  { %s39_s24 = sshll.u32 %s202_s23, 4  ;;  %p150_p8 = scmp.ne.s32.totalorder %s256_s1, %s149_s27  ;;  %s40_s24 = int_to_ptr.vmem [resolvable:$true] %s39_s24 }
  0x15   :  { %p153_p9 = scmp.lt.u32.totalorder %s149_s27, %s256_s1 }
  0x17   :  { %p155_p10 = pnand %p153_p9, %p150_p8 }
  0x19   :  { %158 = shalt.err (!%p155_p10)
}
  0x1a   :  { %s159_s4 = scalar_lea.vmem %s40_s24, 256  ;;  %p164_p12 = scmp.lt.s32.totalorder %s40_s24, %s40_s24 }
  0x1b   :  { %p160_p11 = scmp.ne.s32.totalorder %s40_s24, %s159_s4  ;;  %p165_p13 = scmp.lt.s32.totalorder %s159_s4, %s159_s4 }
  0x1d   :  { %p166_p0 = por %p165_p13, %p164_p12 }
  0x1f   :  { %p167_p1 = pnand %p166_p0, %p160_p11 }
  0x21   :  { %170 = shalt.err (!%p167_p1)
}
  0x22   :  { %45 = dma.hbm_to_vmem [thread:$0]  %s256_s1, 256, %s40_s24, [#allocation6], %s200_s19, %s200_s19, %s201_s20  }
  0x23   :  { %193 = dma.done.wait [#allocation3], 256  }
  0x24   :  { %194 = vsyncadd [#allocation3], 4294967040 }
  0x25   :  { %195 = dma.done.wait [#allocation6], 256  }
  0x26   :  { %196 = vsyncadd [#allocation6], 4294967040  ;;  %v65_v0 = vld [vmem:[#allocation2] sm:$0xff]  ;;  %v66_v1 = vld [vmem:[#allocation2 + $0x8] sm:$0xff]  ;;  %s203_s1 = smov [#allocation7]  }
  0x27   :  { %v67_v2 = vld [vmem:[#allocation5] sm:$0xff]  ;;  %v68_v3 = vld [vmem:[#allocation5 + $0x8] sm:$0xff]  ;;  %s101_s6 = sshll.u32 %s203_s1, 4  ;;  %s102_s6 = int_to_ptr.vmem [resolvable:$true] %s101_s6 }
  0x28   :  { %v69_v4 = vsub.f32 %v65_v0, %v67_v2  ;;  %v70_v5 = vsub.f32 %v66_v1, %v68_v3  ;;  %s171_s7 = scalar_lea.vmem %s102_s6, 128  ;;  %p176_p3 = scmp.lt.s32.totalorder %s102_s6, %s102_s6 }
  0x29   :  { %p172_p2 = scmp.ne.s32.totalorder %s102_s6, %s171_s7  ;;  %p177_p4 = scmp.lt.s32.totalorder %s171_s7, %s171_s7 }
  0x2a   :  { %v71_v6 = vmul.f32 %v69_v4, %v69_v4  ;;  %v72_v7 = vmul.f32 %v70_v5, %v70_v5 }
  0x2b   :  { %p178_p5 = por %p177_p4, %p176_p3 }
  0x2c   :  { %v73_v8 = vadd.f32 1.0, %v71_v6  ;;  %v74_v9 = vadd.f32 1.0, %v72_v7 }
  0x2d   :  { %p179_p6 = pnand %p178_p5, %p172_p2 }
  0x2e   :  { %123 = vrsqrt.f32 %v73_v8  ;;  %vm77_vm0 = vcmp.eq.f32.partialorder %v73_v8, inf  ;;  %v80_v11 = vand.u32 2147483648, %v73_v8  ;;  %vm79_vm1 = vcmp.eq.f32.partialorder %v73_v8, 0.0 }
  0x2f   :  { %125 = vrsqrt.f32 %v74_v9  ;;  %vm84_vm2 = vcmp.eq.f32.partialorder %v74_v9, inf  ;;  %v87_v14 = vand.u32 2147483648, %v74_v9  ;;  %vm86_vm3 = vcmp.eq.f32.partialorder %v74_v9, 0.0 }
  0x38   :  { %v124_v10 = vpop.eup %123 }
  0x39   :  { %v126_v12 = vpop.eup %125  ;;  %v76_v13 = vmul.f32 %v124_v10, %v73_v8 }
  0x3a   :  { %v83_v15 = vmul.f32 %v126_v12, %v74_v9 }
  0x3b   :  { %v78_v16 = vsel %vm77_vm0, %v73_v8, %v76_v13 }
  0x3c   :  { %v81_v17 = vsel %vm79_vm1, %v80_v11, %v78_v16  ;;  %v85_v18 = vsel %vm84_vm2, %v74_v9, %v83_v15 }
  0x3d   :  { %v88_v19 = vsel %vm86_vm3, %v87_v14, %v85_v18  ;;  %v115_v20 = vadd.f32 -1.0, %v81_v17 }
  0x3e   :  { %v116_v21 = vadd.f32 -1.0, %v88_v19 }
  0x40   :  { %v92_v22 = vadd.f32 %v116_v21, %v115_v20 }
  0x42   :  { %94 = vst [vmem:[#allocation7] sm:$0xff] %v92_v22 }
  0x43   :  { %182 = shalt.err (!%p179_p6)
}
  0x44   :  { %s183_s10 = scalar_lea.hbm %s257_s2, 128 }
  0x45   :  { %p184_p7 = scmp.ne.s32.totalorder %s257_s2, %s183_s10  ;;  %p187_p8 = scmp.lt.u32.totalorder %s183_s10, %s257_s2 }
  0x47   :  { %p189_p9 = pnand %p187_p8, %p184_p7 }
  0x49   :  { %192 = shalt.err (!%p189_p9)
}
  0x4a   :  { %104 = dma.vmem_to_hbm [thread:$0]  %s102_s6, 128, %s257_s2, [#allocation4]  }
  0x4b   :  { %197 = dma.done.wait [#allocation4], 128  }
  0x4c   :  { %198 = vsyncadd [#allocation4], 4294967168 }
  0x4d   :  { %108 = vsyncpa [#allocation3], 1 }
  0x4e   :  { %109 = vsyncpa [#allocation6], 1 }
  0x4f   :  { %110 = vsyncpa [#allocation4], 1 }

</bundles_post_ra>
